<compile_context>
chip_gen: v7x
topology: tpu7x:2x2x1
jax: 0.10.0
libtpu: 0.0.40
codegen_flags: <defaults>
</compile_context>

<pallas_src>
import numpy as np
import jax
import jax.numpy as jnp
from jax.experimental import pallas as pl
from jax.experimental.pallas import tpu as pltpu

# ---------------- configuration (small, consistent with the module) ----------------
BATCH        = 8                          # >= 8 fills an f32 vreg sublane group
NUM_OBS      = 32
NUM_ACTIONS  = 12
HISTORY_LEN  = 8
PRIV_DIM     = 219                        # forced by the hard-coded slices 0:3 ... 218:219
PV_PAD       = 224                        # pv padded to a multiple of 8 rows / tile-aligned
ENC_IN       = NUM_OBS * HISTORY_LEN      # 256
ENCODER_MLP  = [128, 64, 24]              # encoder_mlp_units
ACTOR_HID    = [64, 64, 64]
CRITIC_HID   = [64, 64, 64]
CRITIC_IN    = NUM_OBS + PRIV_DIM         # 251 (concat order inside the module)
INIT_NOISE_STD = 1.0

# ------------------------- packed-parameter slab layout -----------------------------
# Weight slab: (W_ROWS, 128) bf16.  Each block occupies rows [off, off+rows); only the
# true columns are non-zero.  All row offsets are multiples of 8 (sublane aligned).
#   e0   : encoder L0 (256 -> 128), cols 0:128
#   e1   : encoder L1 (128 -> 64),  cols 0:64
#   e2   : encoder L2 (64  -> 24),  cols 16:40  (extrin output lanes)
#   ac0  : obs-shared layer-0 fusion: actor L0 cols 0:64, critic L0 obs-rows cols 64:128
#   c0pv : critic L0 pv-rows (permuted to pv order, 219 true + 5 zero rows), cols 64:128
#   ac1/2: block-diagonal hidden layers (actor rows 0:64 / cols 0:64,
#          critic rows 64:128 / cols 64:128)
#   ac3  : output heads: actor L3 rows 0:64 -> cols 0:12 (mu),
#          critic L3 rows 64:128 -> col 12 (value)
W_LAYOUT = {          # name: (row_offset, rows_sliced_in_kernel)
    "e0":   (0,    ENC_IN),    # 256
    "e1":   (256,  128),
    "e2":   (384,  64),
    "ac0":  (448,  NUM_OBS),   # 32
    "c0pv": (480,  PV_PAD),    # 224 (219 true)
    "ac1":  (704,  128),
    "ac2":  (832,  128),
    "ac3":  (960,  128),
}
W_ROWS = 1088
B_ROWS = 8            # bias slab (8, 128) f32: rows 0-2 encoder, 3-6 fused actor/critic

# packed-output lane layout (single (B, 128) output)
OUT_LANES = 128
OUT_MU  = 0           # lanes  0:12  -> mu
OUT_VAL = 12          # lane   12    -> value
OUT_EXT = 16          # lanes 16:40  -> extrin


# ---------------------------------- Pallas kernel ----------------------------------
def _actor_critic_kernel(obs_ref, pv_ref, hist_ref, w_ref, b_ref, out_ref):
    def w(name):
        off, rows = W_LAYOUT[name]
        return w_ref[off:off + rows, :]          # static, sublane-aligned row slice

    def b(row):
        return b_ref[row:row + 1, :]             # (1, 128) f32 bias row, broadcasts over B

    def dot(x, name):                            # bf16 x bf16 -> f32 accumulate (MXU native)
        return jnp.dot(x.astype(jnp.bfloat16), w(name),
                       preferred_element_type=jnp.float32)

    relu = lambda x: jnp.maximum(x, 0.0)
    # nn.ELU(alpha=1): exp(x)-1 on the negative branch (expm1-level accuracy not needed).
    elu = lambda x: jnp.where(x > 0.0, x, jnp.exp(x) - 1.0)

    # --- DmEncoder: Linear -> ReLU -> Linear -> ReLU -> Linear  (extrin -> lanes 16:40)
    h = relu(dot(hist_ref[...], "e0") + b(0))    # (B, 128), all lanes true
    h = relu(dot(h, "e1") + b(1))                # true lanes 0:64, zeros elsewhere
    ext = dot(h[:, :64], "e2") + b(2)            # true lanes 16:40, zeros elsewhere

    # --- Fused actor/critic trunk.
    # Layer 0: obs drives both heads with ONE dot (actor cols 0:64, critic cols 64:128);
    # the pv contribution (columns at 64:128) reproduces the critic_obs concat exactly:
    #   concat(...) @ W0  ==  obs @ W0[obs rows]  +  pv @ W0[pv rows, permuted].
    x = elu(dot(obs_ref[...], "ac0") + dot(pv_ref[...], "c0pv") + b(3))
    # Layers 1..2: block-diagonal weights advance both trunks per dot; shared bias/ELU.
    x = elu(dot(x, "ac1") + b(4))
    x = elu(dot(x, "ac2") + b(5))
    # Output heads: mu -> lanes 0:12 (from actor rows), value -> lane 12 (critic rows).
    head = dot(x, "ac3") + b(6)

    # mu / value / extrin occupy disjoint lanes and are exactly zero elsewhere
    # (zero weight columns + zero bias lanes), so one add + one unmasked lane-dense
    # (B, 128) store packs all three outputs.
    out_ref[...] = head + ext


def actor_critic_forward(obs_dict, packed, tile_b=None):
    """Returns (mu, sigma, value, extrin) exactly like ActorCritic._actor_critic."""
    obs = obs_dict["obs"]                        # (B, NUM_OBS)
    pv = obs_dict["privileged_info"]             # (B, PRIV_DIM)
    hist = obs_dict["proprio_hist"]              # (B, ENC_IN)
    B = obs.shape[0]

    # pad pv to a lane-aligned width (219 -> 224); extra lanes hit zero weight rows
    pv = jnp.pad(pv, ((0, 0), (0, PV_PAD - pv.shape[1])))

    if tile_b is None:
        tile_b = min(B, 256)                     # 256 fills the v6e/v7x MXU; use 128 on v5e
    assert B % tile_b == 0 and tile_b % 8 == 0

    const = lambda i: (0, 0)                     # weight/bias: same block every grid step
    out = pl.pallas_call(
        _actor_critic_kernel,
        grid=(B // tile_b,),
        in_specs=[
            pl.BlockSpec((tile_b, NUM_OBS), lambda i: (i, 0)),
            pl.BlockSpec((tile_b, PV_PAD), lambda i: (i, 0)),
            pl.BlockSpec((tile_b, ENC_IN), lambda i: (i, 0)),
            pl.BlockSpec((W_ROWS, 128), const),  # weight slab stays VMEM-resident
            pl.BlockSpec((B_ROWS, 128), const),  # bias slab stays VMEM-resident
        ],
        out_specs=pl.BlockSpec((tile_b, OUT_LANES), lambda i: (i, 0)),
        out_shape=jax.ShapeDtypeStruct((B, OUT_LANES), jnp.float32),
        compiler_params=pltpu.CompilerParams(
            dimension_semantics=("parallel",)),  # megacore on v7x for large batch
    )(obs, pv, hist, packed["w"], packed["b"])

    mu     = out[:, OUT_MU:OUT_MU + NUM_ACTIONS]
    value  = out[:, OUT_VAL:OUT_VAL + 1]
    extrin = out[:, OUT_EXT:OUT_EXT + ENCODER_MLP[-1]]
    # Module returns sigma = mu * 0 + std; for finite mu this is a pure broadcast of std.
    sigma = jnp.broadcast_to(packed["std"], mu.shape)
    return mu, sigma, value, extrin


# ------------------------------ deterministic params -------------------------------
def _init_linear(key, in_dim, out_dim):
    kw, kb = jax.random.split(key)
    w = jax.random.normal(kw, (in_dim, out_dim), jnp.float32) * (1.0 / jnp.sqrt(in_dim))
    b = jax.random.normal(kb, (1, out_dim), jnp.float32) * 0.01
    return w, b


def make_params(key):
    keys = jax.random.split(key, 16)
    k = iter(keys)

    enc_dims = [ENC_IN] + ENCODER_MLP
    encoder = [_init_linear(next(k), enc_dims[i], enc_dims[i + 1]) for i in range(3)]

    a_dims = [NUM_OBS] + ACTOR_HID + [NUM_ACTIONS]
    actor = [_init_linear(next(k), a_dims[i], a_dims[i + 1]) for i in range(4)]

    c_dims = [CRITIC_IN] + CRITIC_HID + [1]      # critic W0 acts on concat order
    critic = [_init_linear(next(k), c_dims[i], c_dims[i + 1]) for i in range(4)]

    std = INIT_NOISE_STD * jnp.ones((1, NUM_ACTIONS), jnp.float32)
    return {"encoder": encoder, "actor": actor, "critic": critic, "std": std}


def pack_params(params):
    """Host-side, one-time packing of all weights/biases into two lane-dense slabs."""
    w_slab = np.zeros((W_ROWS, 128), np.float32)
    b_slab = np.zeros((B_ROWS, 128), np.float32)

    def put_w(name, mat, row_off=0, col_off=0):
        off, _ = W_LAYOUT[name]
        mat = np.asarray(mat, np.float32)
        w_slab[off + row_off: off + row_off + mat.shape[0],
               col_off: col_off + mat.shape[1]] = mat

    def put_b(row, vec, col_off=0):
        vec = np.asarray(vec, np.float32).reshape(-1)
        b_slab[row, col_off:col_off + vec.shape[0]] = vec

    (ew0, eb0), (ew1, eb1), (ew2, eb2) = params["encoder"]
    (aw0, ab0), (aw1, ab1), (aw2, ab2), (aw3, ab3) = params["actor"]
    (cw0, cb0), (cw1, cb1), (cw2, cb2), (cw3, cb3) = params["critic"]

    # encoder
    put_w("e0", ew0);                          put_b(0, eb0)
    put_w("e1", ew1);                          put_b(1, eb1)
    put_w("e2", ew2, col_off=OUT_EXT);         put_b(2, eb2, OUT_EXT)   # extrin -> 16:40

    # critic W0 is stored in concat order [vel, obs, hight, mass, push, fric, kpkd]:
    # split it into the obs row-block and a pv-index-ordered row-block.
    cw0 = np.asarray(cw0, np.float32)
    pv_pos_in_concat = np.concatenate([
        np.arange(0, 3),        # pv[0:3]     vel      -> concat rows   0:3
        np.arange(35, 230),     # pv[3:198]   hight    -> concat rows  35:230
        np.arange(234, 236),    # pv[198:200] push     -> concat rows 234:236
        np.arange(230, 234),    # pv[200:204] mass     -> concat rows 230:234
        np.arange(237, 251),    # pv[204:218] kp_kd    -> concat rows 237:251
        np.arange(236, 237),    # pv[218:219] friction -> concat row  236
    ])

    # fused layer 0: actor L0 -> cols 0:64, critic L0 (obs rows) -> cols 64:128
    put_w("ac0", aw0, col_off=0)
    put_w("ac0", cw0[3:35, :], col_off=64)
    put_b(3, ab0, 0); put_b(3, cb0, 64)
    # critic L0 pv rows (permuted), cols 64:128; rows 219:224 stay zero (pv padding)
    put_w("c0pv", cw0[pv_pos_in_concat, :], col_off=64)

    # block-diagonal hidden layers 1..2
    put_w("ac1", aw1, row_off=0,  col_off=0)
    put_w("ac1", cw1, row_off=64, col_off=64)
    put_b(4, ab1, 0); put_b(4, cb1, 64)
    put_w("ac2", aw2, row_off=0,  col_off=0)
    put_w("ac2", cw2, row_off=64, col_off=64)
    put_b(5, ab2, 0); put_b(5, cb2, 64)
    # output heads: mu -> cols 0:12 (actor rows), value -> col 12 (critic rows)
    put_w("ac3", aw3, row_off=0,  col_off=OUT_MU)
    put_w("ac3", cw3, row_off=64, col_off=OUT_VAL)
    put_b(6, ab3, OUT_MU); put_b(6, cb3, OUT_VAL)

    # Weights in bf16 (MXU-native, halves weight DMA bytes); biases stay f32 (4 KiB,
    # DMA-irrelevant, avoids a second rounding).  fp8 on v7x is a further 2x weight-DMA
    # knob if the policy tolerates quantization.
    return {"w": jnp.asarray(w_slab, dtype=jnp.bfloat16),
            "b": jnp.asarray(b_slab, dtype=jnp.float32),
            "std": params["std"]}


# ------------------------------- pure-JAX reference --------------------------------
def _ref_forward(obs_dict, params):
    relu = lambda x: jnp.maximum(x, 0.0)
    elu = lambda x: jnp.where(x > 0.0, x, jnp.exp(x) - 1.0)

    def mlp(x, layers, act, n_act):
        for i, (w, b) in enumerate(layers):
            x = x @ w + b
            if i < n_act:
                x = act(x)
        return x

    obs = obs_dict["obs"]
    pv = obs_dict["privileged_info"]
    hist = obs_dict["proprio_hist"]
    # exact concat order from ActorCritic._actor_critic
    critic_obs = jnp.concatenate(
        [pv[:, 0:3], obs, pv[:, 3:198], pv[:, 200:204], pv[:, 198:200],
         pv[:, 218:219], pv[:, 204:218]], axis=-1)
    extrin = mlp(hist, params["encoder"], relu, 2)
    mu = mlp(obs, params["actor"], elu, 3)
    value = mlp(critic_obs, params["critic"], elu, 3)
    sigma = jnp.broadcast_to(params["std"], mu.shape)
    return mu, sigma, value, extrin


# -------------------------------------- main ---------------------------------------
if __name__ == "__main__":
    key = jax.random.PRNGKey(0)
    kp, k1, k2, k3 = jax.random.split(key, 4)

    params = make_params(kp)
    packed = pack_params(params)            # one-time host-side packing

    obs_dict = {
        "obs": jax.random.normal(k1, (BATCH, NUM_OBS), jnp.float32),
        "privileged_info": jax.random.normal(k2, (BATCH, PRIV_DIM), jnp.float32),
        "proprio_hist": jax.random.normal(k3, (BATCH, ENC_IN), jnp.float32),
    }

    mu, sigma, value, extrin = jax.block_until_ready(
        actor_critic_forward(obs_dict, packed)
    )

    mu_r, sigma_r, value_r, extrin_r = _ref_forward(obs_dict, params)
    assert mu.shape == (BATCH, NUM_ACTIONS) and sigma.shape == (BATCH, NUM_ACTIONS)
    assert value.shape == (BATCH, 1) and extrin.shape == (BATCH, ENCODER_MLP[-1])
    # bf16 weights / bf16 MXU operands -> loosened parity vs. the f32 reference.
    TOL = 3e-2
    assert jnp.allclose(mu, mu_r, rtol=TOL, atol=TOL), "mu mismatch"
    assert jnp.allclose(sigma, sigma_r, rtol=TOL, atol=TOL), "sigma mismatch"
    assert jnp.allclose(value, value_r, rtol=TOL, atol=TOL), "value mismatch"
    assert jnp.allclose(extrin, extrin_r, rtol=TOL, atol=TOL), "extrin mismatch"

    # TODO(synk): torch.distributions.Normal (sample / log_prob / entropy used by
    # act / get_actions_log_prob) is not kernelized; only the deterministic
    # _actor_critic forward is.  If this runs per env step, fuse that math into the
    # kernel tail or batch multiple steps per call to amortize launch overhead.
    print("KERNEL_OK")
</pallas_src>

<mosaic_0001>
module attributes {stable_mosaic.version = 11 : i64} {
  func.func @_actor_critic_kernel(%arg0: i32, %arg1: memref<8x32xf32, #tpu.memory_space<vmem>>, %arg2: memref<8x224xf32, #tpu.memory_space<vmem>>, %arg3: memref<8x256xf32, #tpu.memory_space<vmem>>, %arg4: memref<1088x128xbf16, #tpu.memory_space<vmem>>, %arg5: memref<8x128xf32, #tpu.memory_space<vmem>>, %arg6: memref<8x128xf32, #tpu.memory_space<vmem>>) attributes {dimension_semantics = [#tpu.dimension_semantics<parallel>], iteration_bounds = array<i64: 1>, scalar_prefetch = 0 : i64, scratch_operands = 0 : i64, tpu.core_type = #tpu.core_type<tc>, window_params = [{transform_indices = @transform_0, window_bounds = array<i64: 8, 32>}, {transform_indices = @transform_1, window_bounds = array<i64: 8, 224>}, {transform_indices = @transform_2, window_bounds = array<i64: 8, 256>}, {pipeline_mode = #tpu.pipeline_mode<synchronous>, transform_indices = @transform_3, window_bounds = array<i64: 1088, 128>}, {pipeline_mode = #tpu.pipeline_mode<synchronous>, transform_indices = @transform_4, window_bounds = array<i64: 8, 128>}, {transform_indices = @transform_5, window_bounds = array<i64: 8, 128>}]} {
    %c0 = arith.constant 0 : index
    %c0_0 = arith.constant 0 : index
    %0 = vector.load %arg3[%c0, %c0_0] : memref<8x256xf32, #tpu.memory_space<vmem>>, vector<8x256xf32>
    %1 = arith.truncf %0 : vector<8x256xf32> to vector<8x256xbf16>
    %c0_1 = arith.constant 0 : index
    %c0_2 = arith.constant 0 : index
    %2 = vector.load %arg4[%c0_1, %c0_2] : memref<1088x128xbf16, #tpu.memory_space<vmem>>, vector<256x128xbf16>
    %cst = arith.constant dense<0.000000e+00> : vector<8x128xf32>
    %3 = tpu.matmul %1, %2, %cst {dimension_numbers = #tpu.dot_dimension_numbers<[1], [0], [0], [1], [0, 0, 1, 1], [], []>} : vector<8x256xbf16>, vector<256x128xbf16>, vector<8x128xf32> -> vector<8x128xf32>
    %c0_3 = arith.constant 0 : index
    %c0_4 = arith.constant 0 : index
    %4 = vector.load %arg5[%c0_3, %c0_4] : memref<8x128xf32, #tpu.memory_space<vmem>>, vector<1x128xf32>
    %5 = vector.broadcast %4 : vector<1x128xf32> to vector<8x128xf32>
    %6 = arith.addf %3, %5 : vector<8x128xf32>
    %cst_5 = arith.constant 0.000000e+00 : f32
    %7 = vector.broadcast %cst_5 : f32 to vector<8x128xf32>
    %8 = arith.maximumf %6, %7 : vector<8x128xf32>
    %9 = arith.truncf %8 : vector<8x128xf32> to vector<8x128xbf16>
    %c256 = arith.constant 256 : index
    %c0_6 = arith.constant 0 : index
    %10 = vector.load %arg4[%c256, %c0_6] : memref<1088x128xbf16, #tpu.memory_space<vmem>>, vector<128x128xbf16>
    %cst_7 = arith.constant dense<0.000000e+00> : vector<8x128xf32>
    %11 = tpu.matmul %9, %10, %cst_7 {dimension_numbers = #tpu.dot_dimension_numbers<[1], [0], [0], [1], [0, 0, 1, 1], [], []>} : vector<8x128xbf16>, vector<128x128xbf16>, vector<8x128xf32> -> vector<8x128xf32>
    %c1 = arith.constant 1 : index
    %c0_8 = arith.constant 0 : index
    %12 = vector.load %arg5[%c1, %c0_8] : memref<8x128xf32, #tpu.memory_space<vmem>>, vector<1x128xf32>
    %13 = vector.broadcast %12 : vector<1x128xf32> to vector<8x128xf32>
    %14 = arith.addf %11, %13 : vector<8x128xf32>
    %cst_9 = arith.constant 0.000000e+00 : f32
    %15 = vector.broadcast %cst_9 : f32 to vector<8x128xf32>
    %16 = arith.maximumf %14, %15 : vector<8x128xf32>
    %17 = vector.extract_strided_slice %16 {offsets = [0, 0], sizes = [8, 64], strides = [1, 1]} : vector<8x128xf32> to vector<8x64xf32>
    %18 = arith.truncf %17 : vector<8x64xf32> to vector<8x64xbf16>
    %c384 = arith.constant 384 : index
    %c0_10 = arith.constant 0 : index
    %19 = vector.load %arg4[%c384, %c0_10] : memref<1088x128xbf16, #tpu.memory_space<vmem>>, vector<64x128xbf16>
    %cst_11 = arith.constant dense<0.000000e+00> : vector<8x128xf32>
    %20 = tpu.matmul %18, %19, %cst_11 {dimension_numbers = #tpu.dot_dimension_numbers<[1], [0], [0], [1], [0, 0, 1, 1], [], []>} : vector<8x64xbf16>, vector<64x128xbf16>, vector<8x128xf32> -> vector<8x128xf32>
    %c2 = arith.constant 2 : index
    %c0_12 = arith.constant 0 : index
    %21 = vector.load %arg5[%c2, %c0_12] : memref<8x128xf32, #tpu.memory_space<vmem>>, vector<1x128xf32>
    %22 = vector.broadcast %21 : vector<1x128xf32> to vector<8x128xf32>
    %23 = arith.addf %20, %22 : vector<8x128xf32>
    %c0_13 = arith.constant 0 : index
    %c0_14 = arith.constant 0 : index
    %24 = vector.load %arg1[%c0_13, %c0_14] : memref<8x32xf32, #tpu.memory_space<vmem>>, vector<8x32xf32>
    %25 = arith.truncf %24 : vector<8x32xf32> to vector<8x32xbf16>
    %c448 = arith.constant 448 : index
    %c0_15 = arith.constant 0 : index
    %26 = vector.load %arg4[%c448, %c0_15] : memref<1088x128xbf16, #tpu.memory_space<vmem>>, vector<32x128xbf16>
    %cst_16 = arith.constant dense<0.000000e+00> : vector<8x128xf32>
    %27 = tpu.matmul %25, %26, %cst_16 {dimension_numbers = #tpu.dot_dimension_numbers<[1], [0], [0], [1], [0, 0, 1, 1], [], []>} : vector<8x32xbf16>, vector<32x128xbf16>, vector<8x128xf32> -> vector<8x128xf32>
    %c0_17 = arith.constant 0 : index
    %c0_18 = arith.constant 0 : index
    %28 = vector.load %arg2[%c0_17, %c0_18] : memref<8x224xf32, #tpu.memory_space<vmem>>, vector<8x224xf32>
    %29 = arith.truncf %28 : vector<8x224xf32> to vector<8x224xbf16>
    %c480 = arith.constant 480 : index
    %c0_19 = arith.constant 0 : index
    %30 = vector.load %arg4[%c480, %c0_19] : memref<1088x128xbf16, #tpu.memory_space<vmem>>, vector<224x128xbf16>
    %cst_20 = arith.constant dense<0.000000e+00> : vector<8x128xf32>
    %31 = tpu.matmul %29, %30, %cst_20 {dimension_numbers = #tpu.dot_dimension_numbers<[1], [0], [0], [1], [0, 0, 1, 1], [], []>} : vector<8x224xbf16>, vector<224x128xbf16>, vector<8x128xf32> -> vector<8x128xf32>
    %32 = arith.addf %27, %31 : vector<8x128xf32>
    %c3 = arith.constant 3 : index
    %c0_21 = arith.constant 0 : index
    %33 = vector.load %arg5[%c3, %c0_21] : memref<8x128xf32, #tpu.memory_space<vmem>>, vector<1x128xf32>
    %34 = vector.broadcast %33 : vector<1x128xf32> to vector<8x128xf32>
    %35 = arith.addf %32, %34 : vector<8x128xf32>
    %cst_22 = arith.constant 0.000000e+00 : f32
    %36 = vector.broadcast %cst_22 : f32 to vector<8x128xf32>
    %37 = arith.cmpf ogt, %35, %36 : vector<8x128xf32>
    %38 = math.exp %35 : vector<8x128xf32>
    %cst_23 = arith.constant 1.000000e+00 : f32
    %39 = vector.broadcast %cst_23 : f32 to vector<8x128xf32>
    %40 = arith.subf %38, %39 : vector<8x128xf32>
    %41 = arith.select %37, %35, %40 : vector<8x128xi1>, vector<8x128xf32>
    %42 = arith.truncf %41 : vector<8x128xf32> to vector<8x128xbf16>
    %c704 = arith.constant 704 : index
    %c0_24 = arith.constant 0 : index
    %43 = vector.load %arg4[%c704, %c0_24] : memref<1088x128xbf16, #tpu.memory_space<vmem>>, vector<128x128xbf16>
    %cst_25 = arith.constant dense<0.000000e+00> : vector<8x128xf32>
    %44 = tpu.matmul %42, %43, %cst_25 {dimension_numbers = #tpu.dot_dimension_numbers<[1], [0], [0], [1], [0, 0, 1, 1], [], []>} : vector<8x128xbf16>, vector<128x128xbf16>, vector<8x128xf32> -> vector<8x128xf32>
    %c4 = arith.constant 4 : index
    %c0_26 = arith.constant 0 : index
    %45 = vector.load %arg5[%c4, %c0_26] : memref<8x128xf32, #tpu.memory_space<vmem>>, vector<1x128xf32>
    %46 = vector.broadcast %45 : vector<1x128xf32> to vector<8x128xf32>
    %47 = arith.addf %44, %46 : vector<8x128xf32>
    %cst_27 = arith.constant 0.000000e+00 : f32
    %48 = vector.broadcast %cst_27 : f32 to vector<8x128xf32>
    %49 = arith.cmpf ogt, %47, %48 : vector<8x128xf32>
    %50 = math.exp %47 : vector<8x128xf32>
    %cst_28 = arith.constant 1.000000e+00 : f32
    %51 = vector.broadcast %cst_28 : f32 to vector<8x128xf32>
    %52 = arith.subf %50, %51 : vector<8x128xf32>
    %53 = arith.select %49, %47, %52 : vector<8x128xi1>, vector<8x128xf32>
    %54 = arith.truncf %53 : vector<8x128xf32> to vector<8x128xbf16>
    %c832 = arith.constant 832 : index
    %c0_29 = arith.constant 0 : index
    %55 = vector.load %arg4[%c832, %c0_29] : memref<1088x128xbf16, #tpu.memory_space<vmem>>, vector<128x128xbf16>
    %cst_30 = arith.constant dense<0.000000e+00> : vector<8x128xf32>
    %56 = tpu.matmul %54, %55, %cst_30 {dimension_numbers = #tpu.dot_dimension_numbers<[1], [0], [0], [1], [0, 0, 1, 1], [], []>} : vector<8x128xbf16>, vector<128x128xbf16>, vector<8x128xf32> -> vector<8x128xf32>
    %c5 = arith.constant 5 : index
    %c0_31 = arith.constant 0 : index
    %57 = vector.load %arg5[%c5, %c0_31] : memref<8x128xf32, #tpu.memory_space<vmem>>, vector<1x128xf32>
    %58 = vector.broadcast %57 : vector<1x128xf32> to vector<8x128xf32>
    %59 = arith.addf %56, %58 : vector<8x128xf32>
    %cst_32 = arith.constant 0.000000e+00 : f32
    %60 = vector.broadcast %cst_32 : f32 to vector<8x128xf32>
    %61 = arith.cmpf ogt, %59, %60 : vector<8x128xf32>
    %62 = math.exp %59 : vector<8x128xf32>
    %cst_33 = arith.constant 1.000000e+00 : f32
    %63 = vector.broadcast %cst_33 : f32 to vector<8x128xf32>
    %64 = arith.subf %62, %63 : vector<8x128xf32>
    %65 = arith.select %61, %59, %64 : vector<8x128xi1>, vector<8x128xf32>
    %66 = arith.truncf %65 : vector<8x128xf32> to vector<8x128xbf16>
    %c960 = arith.constant 960 : index
    %c0_34 = arith.constant 0 : index
    %67 = vector.load %arg4[%c960, %c0_34] : memref<1088x128xbf16, #tpu.memory_space<vmem>>, vector<128x128xbf16>
    %cst_35 = arith.constant dense<0.000000e+00> : vector<8x128xf32>
    %68 = tpu.matmul %66, %67, %cst_35 {dimension_numbers = #tpu.dot_dimension_numbers<[1], [0], [0], [1], [0, 0, 1, 1], [], []>} : vector<8x128xbf16>, vector<128x128xbf16>, vector<8x128xf32> -> vector<8x128xf32>
    %c6 = arith.constant 6 : index
    %c0_36 = arith.constant 0 : index
    %69 = vector.load %arg5[%c6, %c0_36] : memref<8x128xf32, #tpu.memory_space<vmem>>, vector<1x128xf32>
    %70 = vector.broadcast %69 : vector<1x128xf32> to vector<8x128xf32>
    %71 = arith.addf %68, %70 : vector<8x128xf32>
    %72 = arith.addf %71, %23 : vector<8x128xf32>
    %c0_37 = arith.constant 0 : index
    %c0_38 = arith.constant 0 : index
    %73 = vector.load %arg6[%c0_37, %c0_38] : memref<8x128xf32, #tpu.memory_space<vmem>>, vector<8x128xf32>
    tpu.vector_store %arg6[%c0_37, %c0_38], %72 {strides = array<i32>} : memref<8x128xf32, #tpu.memory_space<vmem>>, vector<8x128xf32>,
    return
  }
  func.func @transform_0(%arg0: i32) -> (i32, i32) {
    %c0_i32 = arith.constant 0 : i32
    %c0_i32_0 = arith.constant 0 : i32
    return %arg0, %c0_i32 : i32, i32
  }
  func.func @transform_1(%arg0: i32) -> (i32, i32) {
    %c0_i32 = arith.constant 0 : i32
    %c0_i32_0 = arith.constant 0 : i32
    return %arg0, %c0_i32 : i32, i32
  }
  func.func @transform_2(%arg0: i32) -> (i32, i32) {
    %c0_i32 = arith.constant 0 : i32
    %c0_i32_0 = arith.constant 0 : i32
    return %arg0, %c0_i32 : i32, i32
  }
  func.func @transform_3(%arg0: i32) -> (i32, i32) {
    %c0_i32 = arith.constant 0 : i32
    %c0_i32_0 = arith.constant 0 : i32
    %c0_i32_1 = arith.constant 0 : i32
    return %c0_i32, %c0_i32_0 : i32, i32
  }
  func.func @transform_4(%arg0: i32) -> (i32, i32) {
    %c0_i32 = arith.constant 0 : i32
    %c0_i32_0 = arith.constant 0 : i32
    %c0_i32_1 = arith.constant 0 : i32
    return %c0_i32, %c0_i32_0 : i32, i32
  }
  func.func @transform_5(%arg0: i32) -> (i32, i32) {
    %c0_i32 = arith.constant 0 : i32
    %c0_i32_0 = arith.constant 0 : i32
    return %arg0, %c0_i32 : i32, i32
  }
}

</mosaic_0001>

<bundles_post_ra>
// kernel: tpu_custom_call.1
= control target key start
LH: loop header
LB: loop body
LE: loop exit
PB: predicated region body
PF: predicated region fallthrough
CT: control target
= control target key end

     0   :  { %10 = vsyncpa [#allocation3], 0  ;;  %s1667_s0 = inlined_call_operand.hbm [shape: f32[8,32], index: 0, kind: input, shape index: {}]   ;;  %s1668_s1 = inlined_call_operand.hbm [shape: f32[8,224], index: 1, kind: input, shape index: {}]   ;;  %s1669_s2 = inlined_call_operand.hbm [shape: f32[8,256], index: 2, kind: input, shape index: {}]   ;;  %s1670_s3 = inlined_call_operand.hbm [shape: bf16[1088,128], index: 3, kind: input, shape index: {}]   ;;  %s1671_s4 = inlined_call_operand.vmem [shape: f32[8,128], index: 4, kind: input, shape index: {}]   ;;  %s1672_s5 = inlined_call_operand.hbm [shape: f32[8,128], index: 5, kind: output, shape index: {}]  }
   0x1   :  { %11 = vsyncpa [#allocation6], 0 }
   0x2   :  { %12 = vsyncpa [#allocation9], 0 }
   0x3   :  { %13 = vsyncpa [#allocation4], 0  ;;  %s1489_s18 = smov [#allocation5]   ;;  %s1490_s20 = smov [#allocation2]  }
   0x4   :  { %s30_s19 = sshll.u32 %s1489_s18, 4  ;;  %s20_s21 = sshll.u32 %s1490_s20, 4  ;;  %s31_s19 = int_to_ptr.vmem [resolvable:$true] %s30_s19  ;;  %s21_s21 = int_to_ptr.vmem [resolvable:$true] %s20_s21 }
   0x5   :  { %s1371_s24 = scalar_lea.hbm %s1668_s1, 256 }
   0x6   :  { %p1372_p0 = scmp.ne.s32.totalorder %s1668_s1, %s1371_s24  ;;  %p1375_p1 = scmp.lt.u32.totalorder %s1371_s24, %s1668_s1 }
   0x8   :  { %p1377_p2 = pnand %p1375_p1, %p1372_p0 }
   0xa   :  { %1380 = shalt.err (!%p1377_p2)
}
   0xb   :  { %s1381_s29 = scalar_lea.vmem %s31_s19, 256  ;;  %p1386_p4 = scmp.lt.s32.totalorder %s31_s19, %s31_s19 }
   0xc   :  { %p1382_p3 = scmp.ne.s32.totalorder %s31_s19, %s1381_s29  ;;  %p1387_p5 = scmp.lt.s32.totalorder %s1381_s29, %s1381_s29 }
   0xe   :  { %p1388_p6 = por %p1387_p5, %p1386_p4 }
  0x10   :  { %p1389_p7 = pnand %p1388_p6, %p1382_p3 }
  0x12   :  { %1392 = shalt.err (!%p1389_p7)
}
  0x13   :  { %33 = dma.hbm_to_vmem [thread:$0]  %s1668_s1, 256, %s31_s19, [#allocation6]  }
  0x14   :  { %s1393_s9 = scalar_lea.hbm %s1667_s0, 128 }
  0x15   :  { %p1394_p8 = scmp.ne.s32.totalorder %s1667_s0, %s1393_s9  ;;  %p1397_p9 = scmp.lt.u32.totalorder %s1393_s9, %s1667_s0 }
  0x17   :  { %p1399_p10 = pnand %p1397_p9, %p1394_p8 }
  0x19   :  { %1402 = shalt.err (!%p1399_p10)
}
  0x1a   :  { %s1403_s14 = scalar_lea.vmem %s21_s21, 128  ;;  %p1408_p12 = scmp.lt.s32.totalorder %s21_s21, %s21_s21 }
  0x1b   :  { %p1404_p11 = scmp.ne.s32.totalorder %s21_s21, %s1403_s14  ;;  %p1409_p13 = scmp.lt.s32.totalorder %s1403_s14, %s1403_s14 }
  0x1d   :  { %p1410_p0 = por %p1409_p13, %p1408_p12 }
  0x1f   :  { %p1411_p1 = pnand %p1410_p0, %p1404_p11 }
  0x21   :  { %1414 = shalt.err (!%p1411_p1)
}
  0x22   :  { %23 = dma.hbm_to_vmem [thread:$0]  %s1667_s0, 128, %s21_s21, [#allocation3]  }
  0x23   :  { %s1491_s16 = smov [#allocation7]   ;;  %s1492_s18 = smov [#allocation8]  }
  0x24   :  { %s40_s17 = sshll.u32 %s1491_s16, 4  ;;  %s49_s19 = sshll.u32 %s1492_s18, 4  ;;  %s41_s17 = int_to_ptr.vmem [resolvable:$true] %s40_s17  ;;  %s1553_s19 = int_to_ptr.vmem [resolvable:$true] %s49_s19 }
  0x25   :  { %s1415_s23 = scalar_lea.hbm %s1669_s2, 256 }
  0x26   :  { %p1416_p2 = scmp.ne.s32.totalorder %s1669_s2, %s1415_s23  ;;  %p1419_p3 = scmp.lt.u32.totalorder %s1415_s23, %s1669_s2 }
  0x28   :  { %p1421_p4 = pnand %p1419_p3, %p1416_p2 }
  0x2a   :  { %1424 = shalt.err (!%p1421_p4)
}
  0x2b   :  { %s1425_s0 = scalar_lea.vmem %s41_s17, 256  ;;  %p1430_p6 = scmp.lt.s32.totalorder %s41_s17, %s41_s17 }
  0x2c   :  { %p1426_p5 = scmp.ne.s32.totalorder %s41_s17, %s1425_s0  ;;  %p1431_p7 = scmp.lt.s32.totalorder %s1425_s0, %s1425_s0 }
  0x2e   :  { %p1432_p8 = por %p1431_p7, %p1430_p6 }
  0x30   :  { %p1433_p9 = pnand %p1432_p8, %p1426_p5 }
  0x32   :  { %1436 = shalt.err (!%p1433_p9)
}
  0x33   :  { %43 = dma.hbm_to_vmem [thread:$0]  %s1669_s2, 256, %s41_s17, [#allocation6]  }
  0x34   :  { %s1437_s6 = scalar_lea.hbm %s1670_s3, 8704 }
  0x35   :  { %p1438_p10 = scmp.ne.s32.totalorder %s1670_s3, %s1437_s6  ;;  %p1441_p11 = scmp.lt.u32.totalorder %s1437_s6, %s1670_s3 }
  0x37   :  { %p1443_p12 = pnand %p1441_p11, %p1438_p10 }
  0x39   :  { %1446 = shalt.err (!%p1443_p12)
}
  0x3a   :  { %s1447_s11 = scalar_lea.vmem %s1553_s19, 8704  ;;  %p1452_p0 = scmp.lt.s32.totalorder %s1553_s19, %s1553_s19 }
  0x3b   :  { %p1448_p13 = scmp.ne.s32.totalorder %s1553_s19, %s1447_s11  ;;  %p1453_p1 = scmp.lt.s32.totalorder %s1447_s11, %s1447_s11 }
  0x3d   :  { %p1454_p2 = por %p1453_p1, %p1452_p0 }
  0x3f   :  { %p1455_p3 = pnand %p1454_p2, %p1448_p13 }
  0x41   :  { %1458 = shalt.err (!%p1455_p3)
}
  0x42   :  { %s1493_s2 = smov 64   ;;  %s1494_s12 = smov 4  }
  0x43   :  { %55 = dma.hbm_to_vmem [thread:$0]  %s1670_s3, 8704, %s1553_s19, [#allocation9], %s1493_s2, %s1493_s2, %s1494_s12  }
  0x44   :  { %1481 = dma.done.wait [#allocation3], 128  }
  0x45   :  { %1482 = vsyncadd [#allocation3], 4294967168 }
  0x46   :  { %1483 = dma.done.wait [#allocation6], 512  }
  0x47   :  { %1484 = vsyncadd [#allocation6], 4294966784 }
  0x48   :  { %1485 = dma.done.wait [#allocation9], 8704  }
  0x49   :  { %1486 = vsyncadd [#allocation9], 4294958592  ;;  %v1495_v0 = vmov 0.0   ;;  %v1297_v1 = vld [vmem:[#allocation8 + $0x40] sm:$0xff]   ;;  %v1299_v3 = vld [vmem:[#allocation8 + $0x48] sm:$0xff]   ;;  %vm1496_vm0 = vmmov 0  }
  0x4a   :  { %1201 = vmatprep.subr.bf16.mxu0 %v1495_v0  ;;  %v1298_v2 = vld [vmem:[#allocation8] sm:$0xff]   ;;  %1115 = vmatprep.subr.bf16.mxu1 %v1297_v1  ;;  %v1300_v4 = vld [vmem:[#allocation8 + $0x8] sm:$0xff]   ;;  %v1301_v5 = vld [vmem:[#allocation8 + $0x50] sm:$0xff]   ;;  %v1497_v29 = vmov 0   ;;  %vm564_vm1 = vcmask 785408   ;;  %vm398_vm2 = vcmask 523264  }
  0x4b   :  { %1116 = vmatpush3.bf16.msra.mxu1 %v1298_v2  ;;  %v1302_v6 = vld [vmem:[#allocation8 + $0x10] sm:$0xff]   ;;  %v1303_v7 = vld [vmem:[#allocation8 + $0x58] sm:$0xff]   ;;  %v1305_v9 = vld [vmem:[#allocation8 + $0x60] sm:$0xff]   ;;  %1209 = vmatprep.mubr.msk.bf16.mxu0 %vm1496_vm0, %v1495_v0  ;;  %vm620_vm3 = vcmask 261120   ;;  %s1498_s0 = smov [#allocation10]  }
  0x4c   :  { %1117 = vmatprep.subr.bf16.mxu1 %v1299_v3  ;;  %v1304_v8 = vld [vmem:[#allocation8 + $0x18] sm:$0xff]   ;;  %v1306_v10 = vld [vmem:[#allocation8 + $0x20] sm:$0xff]   ;;  %v1307_v11 = vld [vmem:[#allocation8 + $0x68] sm:$0xff]   ;;  %s1023_s21 = sshll.u32 %s1498_s0, 4  ;;  %s1024_s21 = int_to_ptr.vmem [resolvable:$true] %s1023_s21 }
  0x4d   :  { %v72_v12 = vld [vmem:[#allocation7 + $0x8] sm:$0xff]  ;;  %v1308_v14 = vld [vmem:[#allocation8 + $0x28] sm:$0xff]   ;;  %v1309_v15 = vld [vmem:[#allocation8 + $0x70] sm:$0xff]   ;;  %s1459_s28 = scalar_lea.vmem %s1024_s21, 128  ;;  %p1464_p5 = scmp.lt.s32.totalorder %s1024_s21, %s1024_s21 }
  0x4e   :  { %v74_v13 = vpack.c.bf16 %v72_v12, %v72_v12  ;;  %v1310_v16 = vld [vmem:[#allocation8 + $0x30] sm:$0xff]   ;;  %v1311_v17 = vld [vmem:[#allocation8 + $0x78] sm:$0xff]   ;;  %v1313_v20 = vld [vmem:[#allocation8 + $0x80] sm:$0xff]   ;;  %p1460_p4 = scmp.ne.s32.totalorder %s1024_s21, %s1459_s28  ;;  %p1465_p6 = scmp.lt.s32.totalorder %s1459_s28, %s1459_s28 }
  0x4f   :  { %1118 = vmatpush3.bf16.msra.mxu1 %v1300_v4  ;;  %v1312_v18 = vld [vmem:[#allocation8 + $0x38] sm:$0xff]   ;;  %v71_v19 = vld [vmem:[#allocation7] sm:$0xff]  ;;  %v1314_v22 = vld [vmem:[#allocation8 + $0x88] sm:$0xff]  }
  0x50   :  { %1119 = vmatprep.subr.bf16.mxu1 %v1301_v5  ;;  %240 = vmatprep.mubr.bf16.mxu1 %v74_v13  ;;  %v73_v21 = vpack.c.bf16 %v71_v19, %v71_v19  ;;  %v1315_v23 = vld [vmem:[#allocation8 + $0x90] sm:$0xff]   ;;  %v1316_v24 = vld [vmem:[#allocation8 + $0x98] sm:$0xff]   ;;  %v1317_v25 = vld [vmem:[#allocation8 + $0xa0] sm:$0xff]   ;;  %p1466_p7 = por %p1465_p6, %p1464_p5 }
  0x51   :  { %v1318_v26 = vld [vmem:[#allocation8 + $0xa8] sm:$0xff]   ;;  %v1319_v27 = vld [vmem:[#allocation8 + $0xb0] sm:$0xff]   ;;  %v1320_v28 = vld [vmem:[#allocation8 + $0xb8] sm:$0xff]  }
  0x52   :  { %v1330_v30 = vld [vmem:[#allocation8 + $0xc0] sm:$0xff]   ;;  %v1332_v31 = vld [vmem:[#allocation8 + $0xc8] sm:$0xff]   ;;  %v1334_v32 = vld [vmem:[#allocation8 + $0xd0] sm:$0xff]   ;;  %p1467_p8 = pnand %p1466_p7, %p1460_p4 }
  0x53   :  { %1120 = vmatpush3.bf16.msra.mxu1 %v1302_v6  ;;  %1202 = vmatpush3.bf16.msra.mxu0 %v1330_v30  ;;  %v1034_v34 = vld [vmem:[%s1671_s4] ss:$0 sm:$0xff]  ;;  %v1321_v41 = vld [vmem:[#allocation8 + $0xf0] sm:$0xff]   ;;  %v1323_v44 = vld [vmem:[#allocation8 + $0x100] sm:$0xff]  }
  0x54   :  { %1121 = vmatprep.subr.bf16.mxu1 %v1303_v7  ;;  %1203 = vmatprep.subr.bf16.mxu0 %v1495_v0  ;;  %v1322_v43 = vld [vmem:[#allocation8 + $0xf8] sm:$0xff]   ;;  %v1324_v45 = vld [vmem:[#allocation8 + $0x108] sm:$0xff]   ;;  %v1325_v46 = vld [vmem:[#allocation8 + $0x110] sm:$0xff]  }
  0x55   :  { %v1326_v47 = vld [vmem:[#allocation8 + $0x118] sm:$0xff]   ;;  %v1327_v48 = vld [vmem:[#allocation8 + $0x120] sm:$0xff]   ;;  %v1328_v49 = vld [vmem:[#allocation8 + $0x128] sm:$0xff]  }
  0x56   :  { %v1329_v50 = vld [vmem:[#allocation8 + $0x130] sm:$0xff]   ;;  %v1331_v51 = vld [vmem:[#allocation8 + $0x138] sm:$0xff]   ;;  %v1333_v52 = vld [vmem:[#allocation8 + $0x140] sm:$0xff]  }
  0x57   :  { %1122 = vmatpush3.bf16.msra.mxu1 %v1304_v8  ;;  %1204 = vmatpush3.bf16.msra.mxu0 %v1332_v31  ;;  %v1335_v53 = vld [vmem:[#allocation8 + $0x148] sm:$0xff]   ;;  %v1336_v54 = vld [vmem:[#allocation8 + $0xd8] sm:$0xff]   ;;  %v1337_v55 = vld [vmem:[#allocation8 + $0x150] sm:$0xff]  }
  0x58   :  { %1123 = vmatprep.subr.bf16.mxu1 %v1305_v9  ;;  %1205 = vmatprep.subr.bf16.mxu0 %v1495_v0  ;;  %v1339_v56 = vld [vmem:[#allocation8 + $0x158] sm:$0xff]   ;;  %v449_v57 = vld [vmem:[#allocation5 + $0x8] sm:$0xff]  ;;  %v448_v59 = vld [vmem:[#allocation5] sm:$0xff] }
  0x59   :  { %v451_v58 = vpack.c.bf16 %v449_v57, %v449_v57  ;;  %v450_v60 = vpack.c.bf16 %v448_v59, %v448_v59  ;;  %v1051_v61 = vld [vmem:[%s1671_s4 + $0x1] ss:$0 sm:$0xff]  ;;  %v1338_v5 = vld [vmem:[#allocation8 + $0xe0] sm:$0xff]   ;;  %v1340_v7 = vld [vmem:[#allocation8 + $0xe8] sm:$0xff]  }
  0x5a   :  { %v442_v8 = vld [vmem:[#allocation2] sm:$0xff]  ;;  %v1346_v19 = vld [vmem:[#allocation8 + $0x188] sm:$0xff]   ;;  %v1361_v57 = vld [vmem:[#allocation8 + $0x200] sm:$0xff]  }
  0x5b   :  { %1124 = vmatpush3.bf16.msra.mxu1 %v1306_v10  ;;  %1206 = vmatpush3.bf16.msra.mxu0 %v1334_v32  ;;  %v443_v9 = vpack.c.bf16 %v442_v8, %v442_v8  ;;  %v1341_v10 = vld [vmem:[#allocation8 + $0x160] sm:$0xff]   ;;  %v1363_v59 = vld [vmem:[#allocation8 + $0x210] sm:$0xff]  }
  0x5c   :  { %1125 = vmatprep.subr.bf16.mxu1 %v1307_v11  ;;  %1207 = vmatprep.subr.bf16.mxu0 %v1495_v0  ;;  %v1342_v11 = vld [vmem:[#allocation8 + $0x168] sm:$0xff]  }
  0x5f   :  { %1126 = vmatpush3.bf16.msra.mxu1 %v1308_v14  ;;  %1208 = vmatpush3.bf16.msra.mxu0 %v1336_v54  ;;  %v1343_v14 = vld [vmem:[#allocation8 + $0x170] sm:$0xff]   ;;  %v1358_v54 = vld [vmem:[#allocation8 + $0x1e8] sm:$0xff]  }
  0x60   :  { %1127 = vmatprep.subr.bf16.mxu1 %v1309_v15  ;;  %1213 = vmatprep.subr.bf16.mxu0 %v1495_v0 }
  0x63   :  { %1128 = vmatpush3.bf16.msra.mxu1 %v1310_v16 }
  0x64   :  { %1129 = vmatprep.subr.bf16.mxu1 %v1311_v17  ;;  %v1344_v17 = vld [vmem:[#allocation8 + $0x178] sm:$0xff]  }
  0x67   :  { %1130 = vmatpush3.bf16.msra.mxu1 %v1312_v18  ;;  %v1345_v18 = vld [vmem:[#allocation8 + $0x180] sm:$0xff]  }
  0x68   :  { %1181 = vmatprep.subr.bf16.mxu1 %v1495_v0 }
  0x6a   :  { %241 = vmatmul.mubr.bf16.vlgmr.msra.gmra.mrb[0].mxu1 %v73_v21  ;;  %v1348_v21 = vld [vmem:[#allocation8 + $0x198] sm:$0xff]  }
  0x6b   :  { %1182 = vmatpush3.bf16.msra.mxu1 %v1313_v20  ;;  %1197 = vmatprep.mubr.msk.bf16.mxu1 %vm1496_vm0, %v1495_v0  ;;  %v1347_v20 = vld [vmem:[#allocation8 + $0x190] sm:$0xff]  }
  0x6c   :  { %1183 = vmatprep.subr.bf16.mxu1 %v1495_v0 }
  0x6f   :  { %1184 = vmatpush3.bf16.msra.mxu1 %v1314_v22 }
  0x70   :  { %1185 = vmatprep.subr.bf16.mxu1 %v1495_v0 }
  0x73   :  { %1186 = vmatpush3.bf16.msra.mxu1 %v1315_v23  ;;  %v1084_v23 = vld [vmem:[%s1671_s4 + $0x3] ss:$0 sm:$0xff] }
  0x74   :  { %1187 = vmatprep.subr.bf16.mxu1 %v1495_v0 }
  0x77   :  { %1188 = vmatpush3.bf16.msra.mxu1 %v1316_v24 }
  0x78   :  { %1189 = vmatprep.subr.bf16.mxu1 %v1495_v0 }
  0x7b   :  { %1190 = vmatpush3.bf16.msra.mxu1 %v1317_v25 }
  0x7c   :  { %1191 = vmatprep.subr.bf16.mxu1 %v1495_v0 }
  0x7f   :  { %1192 = vmatpush3.bf16.msra.mxu1 %v1318_v26 }
  0x80   :  { %1193 = vmatprep.subr.bf16.mxu1 %v1495_v0 }
  0x83   :  { %1194 = vmatpush3.bf16.msra.mxu1 %v1319_v27 }
  0x84   :  { %1195 = vmatprep.subr.bf16.mxu1 %v1495_v0 }
  0x87   :  { %1196 = vmatpush3.bf16.msra.mxu1 %v1320_v28 }
  0x88   :  { %568 = vmatprep.subr.bf16.mxu1 %v1497_v29 }
 0x13d   :  { %v1131_v33 = vpop.f32.mrb[0].mxu1 }
 0x13e   :  { %v1132_v35 = vpop.f32.mrb[1].mxu1 }
 0x13f   :  { %v1133_v36 = vadd.f32 %v1132_v35, %v1131_v33  ;;  %v1134_v37 = vpop.f32.mrb[2].mxu1  ;;  %v1349_v33 = vld [vmem:[#allocation8 + $0x1a0] sm:$0xff]   ;;  %v1350_v35 = vld [vmem:[#allocation8 + $0x1a8] sm:$0xff]  }
 0x140   :  { %v1135_v38 = vpop.f32.mrb[3].mxu1  ;;  %v1352_v37 = vld [vmem:[#allocation8 + $0x1b8] sm:$0xff]  }
 0x141   :  { %v243_v39 = vadd.f32 %v1133_v36, %v1034_v34  ;;  %v1351_v36 = vld [vmem:[#allocation8 + $0x1b0] sm:$0xff]   ;;  %v1353_v38 = vld [vmem:[#allocation8 + $0x1c0] sm:$0xff]  }
 0x143   :  { %v248_v40 = vmax.f32 %v243_v39, 0.0  ;;  %v1354_v39 = vld [vmem:[#allocation8 + $0x1c8] sm:$0xff]  }
 0x145   :  { %v249_v42 = vpack.c.bf16 %v248_v40, %v248_v40  ;;  %v1355_v40 = vld [vmem:[#allocation8 + $0x1d0] sm:$0xff]  }
 0x147   :  { %1198 = vmatmul.mubr.bf16.vlgmr.msra.gmra.mrb[4].mxu1 %v249_v42  ;;  %v1086_v42 = vld [vmem:[%s1671_s4 + $0x4] ss:$0 sm:$0xff] }
 0x148   :  { %569 = vmatpush1.bf16.msra.mxu1 %v1321_v41  ;;  %1080 = vmatprep.mubr.msk.bf16.mxu1 %vm564_vm1, %v451_v58  ;;  %v1356_v41 = vld [vmem:[#allocation8 + $0x1d8] sm:$0xff]   ;;  %v1362_v58 = vld [vmem:[#allocation8 + $0x208] sm:$0xff]  }
 0x149   :  { %570 = vmatprep.subr.bf16.mxu1 %v1497_v29 }
 0x14c   :  { %571 = vmatpush1.bf16.msra.mxu1 %v1322_v43 }
 0x14d   :  { %572 = vmatprep.subr.bf16.mxu1 %v1497_v29 }
 0x150   :  { %573 = vmatpush1.bf16.msra.mxu1 %v1323_v44 }
 0x151   :  { %574 = vmatprep.subr.bf16.mxu1 %v1497_v29 }
 0x154   :  { %575 = vmatpush1.bf16.msra.mxu1 %v1324_v45 }
 0x155   :  { %576 = vmatprep.subr.bf16.mxu1 %v1497_v29 }
 0x158   :  { %577 = vmatpush1.bf16.msra.mxu1 %v1325_v46 }
 0x159   :  { %578 = vmatprep.subr.bf16.mxu1 %v1497_v29 }
 0x15c   :  { %579 = vmatpush1.bf16.msra.mxu1 %v1326_v47 }
 0x15d   :  { %580 = vmatprep.subr.bf16.mxu1 %v1497_v29 }
 0x160   :  { %581 = vmatpush1.bf16.msra.mxu1 %v1327_v48 }
 0x161   :  { %582 = vmatprep.subr.bf16.mxu1 %v1497_v29 }
 0x164   :  { %583 = vmatpush1.bf16.msra.mxu1 %v1328_v49 }
 0x165   :  { %584 = vmatprep.subr.bf16.mxu1 %v1497_v29 }
 0x168   :  { %585 = vmatpush1.bf16.msra.mxu1 %v1329_v50 }
 0x169   :  { %586 = vmatprep.subr.bf16.mxu1 %v1497_v29 }
 0x16c   :  { %587 = vmatpush1.bf16.msra.mxu1 %v1331_v51 }
 0x16d   :  { %588 = vmatprep.subr.bf16.mxu1 %v1497_v29 }
 0x170   :  { %589 = vmatpush1.bf16.msra.mxu1 %v1333_v52  ;;  %v1357_v52 = vld [vmem:[#allocation8 + $0x1e0] sm:$0xff]  }
 0x171   :  { %590 = vmatprep.subr.bf16.mxu1 %v1497_v29 }
 0x174   :  { %591 = vmatpush1.bf16.msra.mxu1 %v1335_v53 }
 0x175   :  { %592 = vmatprep.subr.bf16.mxu1 %v1497_v29 }
 0x178   :  { %593 = vmatpush1.bf16.msra.mxu1 %v1337_v55  ;;  %v1359_v55 = vld [vmem:[#allocation8 + $0x1f0] sm:$0xff]  }
 0x179   :  { %594 = vmatprep.subr.bf16.mxu1 %v1497_v29 }
 0x17c   :  { %595 = vmatpush1.bf16.msra.mxu1 %v1339_v56  ;;  %v1360_v56 = vld [vmem:[#allocation8 + $0x1f8] sm:$0xff]  }
 0x17f   :  { %601 = vmatmul.mubr.bf16.vlgmr.msra.gmra.mrb[8].mxu1 %v450_v60  ;;  %v1364_v60 = vld [vmem:[#allocation8 + $0x218] sm:$0xff]  }
 0x21a   :  { %v353_v62 = vpop.f32.mrb[4].mxu1 }
 0x21b   :  { %v354_v63 = vadd.f32 %v1051_v61, %v353_v62  ;;  %v1199_v1 = vpop.f32.mrb[5].mxu1  ;;  %v1096_v61 = vld [vmem:[%s1671_s4 + $0x5] ss:$0 sm:$0xff] }
 0x21c   :  { %v356_v2 = vpop.f32.mrb[6].mxu1 }
 0x21d   :  { %v359_v3 = vmax.f32 %v354_v63, 0.0  ;;  %v1200_v4 = vpop.f32.mrb[7].mxu1 }
 0x21f   :  { %v360_v6 = vpack.c.bf16 %v359_v3, %v359_v3 }
 0x221   :  { %1210 = vmatmul.mubr.msk.bf16.vlgmr.msra.gmra.mrb[0].mxu0 %vm398_vm2, %v360_v6 }
 0x222   :  { %1214 = vmatpush3.bf16.msra.mxu0 %v1338_v5  ;;  %1217 = vmatprep.mubr.msk.bf16.mxu0 %vm1496_vm0, %v1495_v0 }
 0x223   :  { %1215 = vmatprep.subr.bf16.mxu0 %v1495_v0 }
 0x226   :  { %1216 = vmatpush3.bf16.msra.mxu0 %v1340_v7 }
 0x227   :  { %1221 = vmatprep.subr.bf16.mxu0 %v1495_v0 }
 0x229   :  { %1218 = vmatmul.mubr.msk.bf16.vlgmr.msra.gmra.mrb[4].mxu0 %vm620_vm3, %v443_v9  ;;  %v1106_v9 = vld [vmem:[%s1671_s4 + $0x6] ss:$0 sm:$0xff] }
 0x22a   :  { %1222 = vmatpush3.bf16.msra.mxu0 %v1341_v10  ;;  %1237 = vmatprep.mubr.msk.bf16.mxu0 %vm1496_vm0, %v1495_v0 }
 0x22b   :  { %1223 = vmatprep.subr.bf16.mxu0 %v1495_v0 }
 0x22e   :  { %1224 = vmatpush3.bf16.msra.mxu0 %v1342_v11 }
 0x22f   :  { %1225 = vmatprep.subr.bf16.mxu0 %v1495_v0 }
 0x232   :  { %1226 = vmatpush3.bf16.msra.mxu0 %v1343_v14 }
 0x233   :  { %1227 = vmatprep.subr.bf16.mxu0 %v1495_v0 }
 0x236   :  { %1228 = vmatpush3.bf16.msra.mxu0 %v1344_v17 }
 0x237   :  { %1229 = vmatprep.subr.bf16.mxu0 %v1495_v0 }
 0x23a   :  { %1230 = vmatpush3.bf16.msra.mxu0 %v1345_v18 }
 0x23b   :  { %1231 = vmatprep.subr.bf16.mxu0 %v1495_v0 }
 0x23e   :  { %1232 = vmatpush3.bf16.msra.mxu0 %v1346_v19 }
 0x23f   :  { %1233 = vmatprep.subr.bf16.mxu0 %v1495_v0 }
 0x242   :  { %1234 = vmatpush3.bf16.msra.mxu0 %v1347_v20 }
 0x243   :  { %1235 = vmatprep.subr.bf16.mxu0 %v1495_v0 }
 0x246   :  { %1236 = vmatpush3.bf16.msra.mxu0 %v1348_v21 }
 0x247   :  { %1241 = vmatprep.subr.bf16.mxu0 %v1495_v0 }
 0x252   :  { %v602_v12 = vpop.f32.mrb[8].mxu1 }
 0x253   :  { %v604_v13 = vpop.f32.mrb[9].mxu1 }
 0x254   :  { %v605_v15 = vpop.f32.mrb[10].mxu1 }
 0x255   :  { %v606_v16 = vpop.f32.mrb[11].mxu1 }
 0x2fc   :  { %v658_v22 = vpop.f32.mrb[4].mxu0 }
 0x2fd   :  { %v659_v24 = vadd.f32 %v658_v22, %v602_v12  ;;  %v1219_v25 = vpop.f32.mrb[5].mxu0 }
 0x2fe   :  { %v661_v26 = vpop.f32.mrb[6].mxu0 }
 0x2ff   :  { %v669_v27 = vadd.f32 %v1084_v23, %v659_v24  ;;  %v1220_v28 = vpop.f32.mrb[7].mxu0 }
 0x301   :  { %v671_v29 = vmul.f32 1.442695, %v669_v27  ;;  %vm670_vm4 = vcmp.gt.f32.partialorder %v669_v27, 0.0 }
 0x303   :  { %1365 = vpow2.f32 %v671_v29 }
 0x30d   :  { %v1366_v30 = vpop.eup %1365 }
 0x30e   :  { %v1085_v31 = vadd.f32 -1.0, %v1366_v30 }
 0x310   :  { %v674_v32 = vsel %vm670_vm4, %v669_v27, %v1085_v31 }
 0x311   :  { %v675_v34 = vpack.c.bf16 %v674_v32, %v674_v32 }
 0x313   :  { %1238 = vmatmul.mubr.bf16.vlgmr.msra.gmra.mrb[8].mxu0 %v675_v34 }
 0x314   :  { %1242 = vmatpush3.bf16.msra.mxu0 %v1349_v33  ;;  %1257 = vmatprep.mubr.msk.bf16.mxu0 %vm1496_vm0, %v1495_v0 }
 0x315   :  { %1243 = vmatprep.subr.bf16.mxu0 %v1495_v0 }
 0x318   :  { %1244 = vmatpush3.bf16.msra.mxu0 %v1350_v35 }
 0x319   :  { %1245 = vmatprep.subr.bf16.mxu0 %v1495_v0 }
 0x31c   :  { %1246 = vmatpush3.bf16.msra.mxu0 %v1351_v36 }
 0x31d   :  { %1247 = vmatprep.subr.bf16.mxu0 %v1495_v0 }
 0x320   :  { %1248 = vmatpush3.bf16.msra.mxu0 %v1352_v37 }
 0x321   :  { %1249 = vmatprep.subr.bf16.mxu0 %v1495_v0 }
 0x324   :  { %1250 = vmatpush3.bf16.msra.mxu0 %v1353_v38 }
 0x325   :  { %1251 = vmatprep.subr.bf16.mxu0 %v1495_v0 }
 0x328   :  { %1252 = vmatpush3.bf16.msra.mxu0 %v1354_v39 }
 0x329   :  { %1253 = vmatprep.subr.bf16.mxu0 %v1495_v0 }
 0x32c   :  { %1254 = vmatpush3.bf16.msra.mxu0 %v1355_v40 }
 0x32d   :  { %1255 = vmatprep.subr.bf16.mxu0 %v1495_v0 }
 0x330   :  { %1256 = vmatpush3.bf16.msra.mxu0 %v1356_v41 }
 0x331   :  { %1261 = vmatprep.subr.bf16.mxu0 %v1495_v0 }
 0x3e6   :  { %v779_v43 = vpop.f32.mrb[8].mxu0 }
 0x3e7   :  { %v780_v44 = vadd.f32 %v1086_v42, %v779_v43  ;;  %v1239_v45 = vpop.f32.mrb[9].mxu0 }
 0x3e8   :  { %v782_v46 = vpop.f32.mrb[10].mxu0 }
 0x3e9   :  { %v786_v47 = vmul.f32 1.442695, %v780_v44  ;;  %v1240_v48 = vpop.f32.mrb[11].mxu0  ;;  %vm785_vm5 = vcmp.gt.f32.partialorder %v780_v44, 0.0 }
 0x3eb   :  { %1367 = vpow2.f32 %v786_v47 }
 0x3f5   :  { %v1368_v49 = vpop.eup %1367 }
 0x3f6   :  { %v1095_v50 = vadd.f32 -1.0, %v1368_v49 }
 0x3f8   :  { %v789_v51 = vsel %vm785_vm5, %v780_v44, %v1095_v50 }
 0x3f9   :  { %v790_v53 = vpack.c.bf16 %v789_v51, %v789_v51 }
 0x3fb   :  { %1258 = vmatmul.mubr.bf16.vlgmr.msra.gmra.mrb[12].mxu0 %v790_v53 }
 0x3fc   :  { %1262 = vmatpush3.bf16.msra.mxu0 %v1357_v52  ;;  %1277 = vmatprep.mubr.msk.bf16.mxu0 %vm1496_vm0, %v1495_v0 }
 0x3fd   :  { %1263 = vmatprep.subr.bf16.mxu0 %v1495_v0 }
 0x400   :  { %1264 = vmatpush3.bf16.msra.mxu0 %v1358_v54 }
 0x401   :  { %1265 = vmatprep.subr.bf16.mxu0 %v1495_v0 }
 0x404   :  { %1266 = vmatpush3.bf16.msra.mxu0 %v1359_v55 }
 0x405   :  { %1267 = vmatprep.subr.bf16.mxu0 %v1495_v0 }
 0x408   :  { %1268 = vmatpush3.bf16.msra.mxu0 %v1360_v56 }
 0x409   :  { %1269 = vmatprep.subr.bf16.mxu0 %v1495_v0 }
 0x40c   :  { %1270 = vmatpush3.bf16.msra.mxu0 %v1361_v57 }
 0x40d   :  { %1271 = vmatprep.subr.bf16.mxu0 %v1495_v0 }
 0x410   :  { %1272 = vmatpush3.bf16.msra.mxu0 %v1362_v58 }
 0x411   :  { %1273 = vmatprep.subr.bf16.mxu0 %v1495_v0 }
 0x414   :  { %1274 = vmatpush3.bf16.msra.mxu0 %v1363_v59 }
 0x415   :  { %1275 = vmatprep.subr.bf16.mxu0 %v1495_v0  ;;  %v1060_v0 = vld [vmem:[%s1671_s4 + $0x2] ss:$0 sm:$0xff] }
 0x416   :  { %v1281_v10 = vadd.f32 %v1106_v9, %v1060_v0 }
 0x418   :  { %1276 = vmatpush3.bf16.msra.mxu0 %v1364_v60 }
 0x4ce   :  { %v894_v62 = vpop.f32.mrb[12].mxu0 }
 0x4cf   :  { %v895_v63 = vadd.f32 %v1096_v61, %v894_v62  ;;  %v1259_v1 = vpop.f32.mrb[13].mxu0 }
 0x4d0   :  { %v897_v2 = vpop.f32.mrb[14].mxu0 }
 0x4d1   :  { %v901_v3 = vmul.f32 1.442695, %v895_v63  ;;  %v1260_v4 = vpop.f32.mrb[15].mxu0  ;;  %vm900_vm6 = vcmp.gt.f32.partialorder %v895_v63, 0.0 }
 0x4d3   :  { %1369 = vpow2.f32 %v901_v3 }
 0x4dd   :  { %v1370_v5 = vpop.eup %1369 }
 0x4de   :  { %v1105_v6 = vadd.f32 -1.0, %v1370_v5 }
 0x4e0   :  { %v904_v7 = vsel %vm900_vm6, %v895_v63, %v1105_v6 }
 0x4e1   :  { %v905_v8 = vpack.c.bf16 %v904_v7, %v904_v7 }
 0x4e3   :  { %1278 = vmatmul.mubr.bf16.vlgmr.msra.gmra.mrb[0].mxu0 %v905_v8 }
 0x5b6   :  { %v1009_v11 = vpop.f32.mrb[0].mxu0 }
 0x5b7   :  { %v1282_v12 = vadd.f32 %v1281_v10, %v1009_v11  ;;  %v1279_v13 = vpop.f32.mrb[1].mxu0 }
 0x5b8   :  { %v1012_v14 = vpop.f32.mrb[2].mxu0 }
 0x5b9   :  { %1016 = vst [vmem:[#allocation10] sm:$0xff] %v1282_v12  ;;  %v1280_v15 = vpop.f32.mrb[3].mxu0 }
 0x5ba   :  { %1470 = shalt.err (!%p1467_p8)
}
 0x5bb   :  { %s1471_s4 = scalar_lea.hbm %s1672_s5, 128 }
 0x5bc   :  { %p1472_p9 = scmp.ne.s32.totalorder %s1672_s5, %s1471_s4  ;;  %p1475_p10 = scmp.lt.u32.totalorder %s1471_s4, %s1672_s5 }
 0x5be   :  { %p1477_p11 = pnand %p1475_p10, %p1472_p9 }
 0x5c0   :  { %1480 = shalt.err (!%p1477_p11)
}
 0x5c1   :  { %1026 = dma.vmem_to_hbm [thread:$0]  %s1024_s21, 128, %s1672_s5, [#allocation4]  }
 0x5c2   :  { %1487 = dma.done.wait [#allocation4], 128  }
 0x5c3   :  { %1488 = vsyncadd [#allocation4], 4294967168 }
 0x5c4   :  { %1030 = vsyncpa [#allocation3], 1 }
 0x5c5   :  { %1031 = vsyncpa [#allocation6], 1 }
 0x5c6   :  { %1032 = vsyncpa [#allocation9], 1 }
 0x5c7   :  { %1033 = vsyncpa [#allocation4], 1 }

</bundles_post_ra>
